<compile_context>
chip_gen: v7x
topology: tpu7x:2x2x1
jax: 0.10.0
libtpu: 0.0.40
codegen_flags: <defaults>
</compile_context>

<pallas_src>
import functools

import jax
import jax.numpy as jnp
from jax import lax
from jax.experimental import pallas as pl
from jax.experimental.pallas import tpu as pltpu

BN_EPS = 1e-5


# ---------------------------------------------------------------------------
# Pallas kernel: fused ShuffleNetUnit forward (stride == 1), one image / step
#   h1  = relu(W1' @ x + b1)                (g_conv1 + BN1 + ReLU, shuffle folded)
#   h2  = W2' @ im2col(h1) + b2'            (dw_conv + BNd + g_conv2 + BN2 fused)
#   out = relu(h2 + x)                      (identity shortcut)
# Layout: channels on sublanes, flattened H*W (padded to a multiple of 128) on lanes.
# ---------------------------------------------------------------------------
def _shuffle_unit_kernel(x_ref, w1_ref, b1_ref, w2_ref, b2_ref, mask_ref, out_ref,
                         *, img_w):
    x = x_ref[...]                                     # (Cin, HWp) f32
    hwp = x.shape[1]

    # --- stage 1: 1x1 grouped conv (dense, BN1 scale + shuffle folded) + ReLU --
    h1 = jnp.dot(w1_ref[...], x.astype(jnp.bfloat16),
                 preferred_element_type=jnp.float32)
    h1 = jnp.maximum(h1 + b1_ref[...], 0.0)            # (mid_pad, HWp) f32

    # --- im2col: 9 taps via XLU lane rolls + precomputed boundary masks --------
    # mid_pad is a multiple of 8, so the tap blocks concat at aligned offsets.
    taps = []
    t = 0
    for dy in (-1, 0, 1):
        for dx in (-1, 0, 1):
            if dy == 0 and dx == 0:
                taps.append(h1)
                continue
            s = dy * img_w + dx                        # lane offset of this tap
            rolled = pltpu.roll(h1, shift=(-s) % hwp, axis=1)   # result[:, r] = h1[:, r+s]
            taps.append(rolled * mask_ref[t:t + 1, :])          # f32 mask mul (v5e-safe)
            t += 1
    im2col = jnp.concatenate(taps, axis=0)             # (9*mid_pad, HWp) f32

    # --- stages 2+3 fused: one MXU matmul + bias -------------------------------
    # TODO(synk): at real ShuffleNet sizes (mid>=60, lane tiles >=512) write taps
    # into an 8-aligned VMEM scratch instead of a live concat, and on v5e keep the
    # per-group block structure to avoid the ~8x dense-FLOP inflation.
    h2 = jnp.dot(w2_ref[...], im2col.astype(jnp.bfloat16),
                 preferred_element_type=jnp.float32)
    h2 = h2 + b2_ref[...]                              # (Cout, HWp) f32

    # --- identity shortcut + ReLU (stride == 1, Cin == Cout) -------------------
    out_ref[...] = jnp.maximum(h2 + x, 0.0).astype(out_ref.dtype)


def _build_tap_masks(H, W, hwp):
    """(8, hwp) f32 mask table: one row per non-center 3x3 tap.

    mask[t, r] = 1.0 iff lane r is a real pixel AND its (dy, dx) neighbour lies
    inside the image; this also kills contributions from lane padding and from
    roll wrap-around.
    """
    r = jnp.arange(hwp, dtype=jnp.int32)
    in_img = r < H * W
    yy = r // W
    xx = r % W
    rows = []
    for dy in (-1, 0, 1):
        for dx in (-1, 0, 1):
            if dy == 0 and dx == 0:
                continue
            ok = (in_img & (yy + dy >= 0) & (yy + dy < H)
                  & (xx + dx >= 0) & (xx + dx < W))
            rows.append(ok)
    return jnp.stack(rows).astype(jnp.float32)          # (8, hwp)


def shufflenet_unit_forward(x_nchw, kparams, *, stride):
    if stride != 1:
        # TODO(synk): stride==2 branch (3x3 AvgPool shortcut + channel concat) not
        # implemented; this config exercises the stride==1 (residual-add) path.
        raise NotImplementedError("only the stride==1 ShuffleNetUnit variant is implemented")

    N, Cin, H, W = x_nchw.shape
    w1c, b1c, w2c, b2c = kparams
    mid_pad = w1c.shape[0]
    Cout = w2c.shape[0]
    assert Cin == Cout, "identity shortcut requires in_channels == out_channels"

    HW = H * W
    HWp = ((HW + 127) // 128) * 128          # lane-dense per-image slab (multiple of 128)

    # NCHW -> (N, C, H*W): a free reshape (NO HBM transpose); pad lanes only.
    x3 = x_nchw.reshape(N, Cin, HW).astype(jnp.float32)
    if HWp != HW:
        x3 = jnp.pad(x3, ((0, 0), (0, 0), (0, HWp - HW)))

    masks = _build_tap_masks(H, W, HWp)      # (8, HWp)

    # TODO(synk): for real feature maps (H*W large, C>=240) tile the lane axis in
    # row blocks with per-tile halo masks, cap the tile for v7x's 64 MiB VMEM via
    # vmem_limit_bytes, and carry the (N, C, H*W) layout between units.
    kernel = functools.partial(_shuffle_unit_kernel, img_w=W)
    out3 = pl.pallas_call(
        kernel,
        out_shape=jax.ShapeDtypeStruct((N, Cout, HWp), jnp.float32),
        grid=(N,),                            # one image per step: >=2 parallel steps
        in_specs=[
            pl.BlockSpec((None, Cin, HWp), lambda n: (n, 0, 0)),   # x  (per image)
            pl.BlockSpec(w1c.shape, lambda n: (0, 0)),             # W1' (bf16)
            pl.BlockSpec(b1c.shape, lambda n: (0, 0)),             # b1
            pl.BlockSpec(w2c.shape, lambda n: (0, 0)),             # W2' (bf16)
            pl.BlockSpec(b2c.shape, lambda n: (0, 0)),             # b2'
            pl.BlockSpec(masks.shape, lambda n: (0, 0)),           # tap masks
        ],
        out_specs=pl.BlockSpec((None, Cout, HWp), lambda n: (n, 0, 0)),
        compiler_params=pltpu.CompilerParams(dimension_semantics=("parallel",)),
    )(x3, w1c, b1c, w2c, b2c, masks)

    if HWp != HW:
        out3 = out3[:, :, :HW]
    return out3.reshape(N, Cout, H, W)        # free reshape back to NCHW


# ---------------------------------------------------------------------------
# Deterministic parameter init (same shapes as the PyTorch module __init__)
# ---------------------------------------------------------------------------
def init_params(key, in_channels, out_channels, stride, groups):
    mid = out_channels // 4
    g = 1 if in_channels == 24 else groups        # mirrors the module
    ks = jax.random.split(key, 6)

    def bn(k, c):
        k1, k2, k3, k4 = jax.random.split(k, 4)
        gamma = 1.0 + 0.1 * jax.random.normal(k1, (c,), jnp.float32)
        beta = 0.1 * jax.random.normal(k2, (c,), jnp.float32)
        mean = 0.1 * jax.random.normal(k3, (c,), jnp.float32)
        var = jax.random.uniform(k4, (c,), jnp.float32, 0.5, 1.5)
        return gamma, beta, mean, var

    return {
        "groups": g,
        "stride": stride,
        "w1": 0.2 * jax.random.normal(ks[0], (mid, in_channels // g, 1, 1), jnp.float32),
        "bn1": bn(ks[1], mid),
        "wd": 0.2 * jax.random.normal(ks[2], (mid, mid // g, 3, 3), jnp.float32),
        "bnd": bn(ks[3], mid),
        "w2": 0.2 * jax.random.normal(ks[4], (out_channels, mid // g, 1, 1), jnp.float32),
        "bn2": bn(ks[5], out_channels),
    }


def _bn_scale_shift(bn):
    gamma, beta, mean, var = bn
    s = gamma / jnp.sqrt(var + BN_EPS)
    return s, beta - mean * s


def _dense_1x1(w, cin, cout, g):
    # torch weight (cout, cin//g, 1, 1) -> block-diagonal dense (cin, cout)
    w2d = w[:, :, 0, 0]
    cin_g, cout_g = cin // g, cout // g
    dense = jnp.zeros((cin, cout), jnp.float32)
    for gi in range(g):
        blk = w2d[gi * cout_g:(gi + 1) * cout_g, :].T
        dense = dense.at[gi * cin_g:(gi + 1) * cin_g,
                         gi * cout_g:(gi + 1) * cout_g].set(blk)
    return dense


def _dense_3x3_taps(w, c, g):
    # torch weight (c, c//g, 3, 3) -> (9, c, c) per-tap block-diagonal dense
    cg = c // g
    taps = []
    for ky in range(3):
        for kx in range(3):
            dense = jnp.zeros((c, c), jnp.float32)
            for gi in range(g):
                blk = w[gi * cg:(gi + 1) * cg, :, ky, kx].T
                dense = dense.at[gi * cg:(gi + 1) * cg,
                                 gi * cg:(gi + 1) * cg].set(blk)
            taps.append(dense)
    return jnp.stack(taps)


def prepare_kernel_params(p, in_channels, out_channels):
    """Fold BN scales, channel_shuffle and g_conv2 into the kernel weights.

    Also zero-pads mid up to a multiple of 8 sublanes and stores the MXU
    operands (W1', W2') in bf16.
    """
    g = p["groups"]
    mid = out_channels // 4
    mid_pad = ((mid + 7) // 8) * 8
    hi = lax.Precision.HIGHEST                 # one-time host-side folding, keep it exact

    # stage 1: 1x1 grouped conv -> dense (Cin, mid); fold BN1 scale + shuffle perm
    W1 = _dense_1x1(p["w1"], in_channels, mid, g)            # (Cin, mid)
    s1, b1 = _bn_scale_shift(p["bn1"])
    W1 = W1 * s1[None, :]
    cpg = mid // g
    perm = jnp.array([(k % g) * cpg + (k // g) for k in range(mid)], jnp.int32)
    W1, b1 = W1[:, perm], b1[perm]
    W1p = jnp.zeros((in_channels, mid_pad), jnp.float32).at[:, :mid].set(W1)
    b1p = jnp.zeros((mid_pad,), jnp.float32).at[:mid].set(b1)   # padded rows: relu(0)=0

    # stages 2+3: fold BNd + g_conv2 + BN2 into the 9 dw taps
    Wd = _dense_3x3_taps(p["wd"], mid, g)                    # (9, mid, mid)
    sd, bd = _bn_scale_shift(p["bnd"])
    W2 = _dense_1x1(p["w2"], mid, out_channels, g)           # (mid, Cout)
    s2, b2 = _bn_scale_shift(p["bn2"])
    M = (sd[:, None] * W2) * s2[None, :]                     # (mid, Cout)
    Wtaps = jnp.einsum("kim,mc->kic", Wd, M, precision=hi)   # (9, mid, Cout)
    Wtaps_p = jnp.zeros((9, mid_pad, out_channels), jnp.float32).at[:, :mid, :].set(Wtaps)
    Wstack = Wtaps_p.reshape(9 * mid_pad, out_channels)      # (9*mid_pad, Cout)
    b2p = jnp.einsum("m,mc->c", bd, W2, precision=hi) * s2 + b2   # (Cout,)

    # kernel layout: channels on sublanes, pixels on lanes; MXU weights in bf16
    w1c = W1p.T.astype(jnp.bfloat16)          # (mid_pad, Cin)
    b1c = b1p.reshape(mid_pad, 1)             # f32
    w2c = Wstack.T.astype(jnp.bfloat16)       # (Cout, 9*mid_pad)
    b2c = b2p.reshape(out_channels, 1)        # f32
    return w1c, b1c, w2c, b2c


# ---------------------------------------------------------------------------
# Pure-JAX reference mirroring the PyTorch forward (NCHW, inference-mode BN)
# ---------------------------------------------------------------------------
def _bn_nchw(x, bn):
    gamma, beta, mean, var = bn
    inv = gamma / jnp.sqrt(var + BN_EPS)
    return (x - mean[None, :, None, None]) * inv[None, :, None, None] \
        + beta[None, :, None, None]


def _conv_nchw(x, w, stride, padding, groups):
    return lax.conv_general_dilated(
        x, w, window_strides=(stride, stride), padding=padding,
        dimension_numbers=("NCHW", "OIHW", "NCHW"), feature_group_count=groups)


def _channel_shuffle_ref(x, groups):
    b, c, h, w = x.shape
    return x.reshape(b, groups, c // groups, h, w) \
            .transpose(0, 2, 1, 3, 4).reshape(b, c, h, w)


def shufflenet_unit_reference(x, p):
    g = p["groups"]
    out = _conv_nchw(x, p["w1"], 1, "VALID", g)
    out = jax.nn.relu(_bn_nchw(out, p["bn1"]))
    out = _channel_shuffle_ref(out, g)
    out = _conv_nchw(out, p["wd"], p["stride"], ((1, 1), (1, 1)), g)
    out = _bn_nchw(out, p["bnd"])
    out = _conv_nchw(out, p["w2"], 1, "VALID", g)
    out = _bn_nchw(out, p["bn2"])
    return jax.nn.relu(out + x)          # stride == 1 -> identity shortcut


if __name__ == "__main__":
    N, IN_C, H, W = 2, 16, 8, 8
    OUT_C, GROUPS, STRIDE = 16, 2, 1     # stride=1 -> residual-add branch

    key = jax.random.PRNGKey(0)
    kx, kp = jax.random.split(key)
    x = jax.random.normal(kx, (N, IN_C, H, W), jnp.float32)   # NCHW like PyTorch

    params = init_params(kp, IN_C, OUT_C, STRIDE, GROUPS)
    kparams = prepare_kernel_params(params, IN_C, OUT_C)

    out = shufflenet_unit_forward(x, kparams, stride=STRIDE)
    out = jax.block_until_ready(out)

    ref = shufflenet_unit_reference(x, params)
    assert out.shape == ref.shape == (N, OUT_C, H, W)
    max_err = float(jnp.max(jnp.abs(out - ref)))
    # bf16 MXU operands + BN/conv folding reassociate roundings vs the f32 conv
    # reference -> loosened tolerance (exact structure verified, values approx).
    if not bool(jnp.allclose(out, ref, atol=6e-2, rtol=3e-2)):
        raise SystemExit(f"kernel/reference mismatch: max abs err {max_err}")
    print("KERNEL_OK")
</pallas_src>

<mosaic_0001>
module attributes {stable_mosaic.version = 11 : i64} {
  func.func @_shuffle_unit_kernel(%arg0: i32, %arg1: memref<1x16x128xf32, #tpu.memory_space<vmem>>, %arg2: memref<8x16xbf16, #tpu.memory_space<vmem>>, %arg3: memref<8x1xf32, #tpu.memory_space<vmem>>, %arg4: memref<16x72xbf16, #tpu.memory_space<vmem>>, %arg5: memref<16x1xf32, #tpu.memory_space<vmem>>, %arg6: memref<8x128xf32, #tpu.memory_space<vmem>>, %arg7: memref<1x16x128xf32, #tpu.memory_space<vmem>>) attributes {dimension_semantics = [#tpu.dimension_semantics<parallel>], iteration_bounds = array<i64: 2>, scalar_prefetch = 0 : i64, scratch_operands = 0 : i64, tpu.core_type = #tpu.core_type<tc>, window_params = [{transform_indices = @transform_0, window_bounds = array<i64: 1, 16, 128>}, {pipeline_mode = #tpu.pipeline_mode<synchronous>, transform_indices = @transform_1, window_bounds = array<i64: 8, 16>}, {pipeline_mode = #tpu.pipeline_mode<synchronous>, transform_indices = @transform_2, window_bounds = array<i64: 8, 1>}, {pipeline_mode = #tpu.pipeline_mode<synchronous>, transform_indices = @transform_3, window_bounds = array<i64: 16, 72>}, {pipeline_mode = #tpu.pipeline_mode<synchronous>, transform_indices = @transform_4, window_bounds = array<i64: 16, 1>}, {pipeline_mode = #tpu.pipeline_mode<synchronous>, transform_indices = @transform_5, window_bounds = array<i64: 8, 128>}, {transform_indices = @transform_6, window_bounds = array<i64: 1, 16, 128>}]} {
    %c0 = arith.constant 0 : index
    %c0_0 = arith.constant 0 : index
    %c0_1 = arith.constant 0 : index
    %0 = vector.load %arg1[%c0, %c0_0, %c0_1] : memref<1x16x128xf32, #tpu.memory_space<vmem>>, vector<1x16x128xf32>
    %1 = vector.shape_cast %0 : vector<1x16x128xf32> to vector<16x128xf32>
    %c0_2 = arith.constant 0 : index
    %c0_3 = arith.constant 0 : index
    %2 = vector.load %arg2[%c0_2, %c0_3] : memref<8x16xbf16, #tpu.memory_space<vmem>>, vector<8x16xbf16>
    %3 = arith.truncf %1 : vector<16x128xf32> to vector<16x128xbf16>
    %cst = arith.constant dense<0.000000e+00> : vector<8x128xf32>
    %4 = tpu.matmul %2, %3, %cst {dimension_numbers = #tpu.dot_dimension_numbers<[1], [0], [0], [1], [0, 0, 1, 1], [], []>} : vector<8x16xbf16>, vector<16x128xbf16>, vector<8x128xf32> -> vector<8x128xf32>
    %c0_4 = arith.constant 0 : index
    %c0_5 = arith.constant 0 : index
    %5 = vector.load %arg3[%c0_4, %c0_5] : memref<8x1xf32, #tpu.memory_space<vmem>>, vector<8x1xf32>
    %6 = vector.broadcast %5 : vector<8x1xf32> to vector<8x128xf32>
    %7 = arith.addf %4, %6 : vector<8x128xf32>
    %cst_6 = arith.constant 0.000000e+00 : f32
    %8 = vector.broadcast %cst_6 : f32 to vector<8x128xf32>
    %9 = arith.maximumf %7, %8 : vector<8x128xf32>
    %c9_i32 = arith.constant 9 : i32
    %10 = tpu.dynamic_rotate %9 by %c9_i32 dim 1 : vector<8x128xf32>, i32 -> vector<8x128xf32>
    %c0_7 = arith.constant 0 : index
    %c0_8 = arith.constant 0 : index
    %11 = vector.load %arg6[%c0_7, %c0_8] : memref<8x128xf32, #tpu.memory_space<vmem>>, vector<1x128xf32>
    %12 = vector.broadcast %11 : vector<1x128xf32> to vector<8x128xf32>
    %13 = arith.mulf %10, %12 : vector<8x128xf32>
    %c8_i32 = arith.constant 8 : i32
    %14 = tpu.dynamic_rotate %9 by %c8_i32 dim 1 : vector<8x128xf32>, i32 -> vector<8x128xf32>
    %c1 = arith.constant 1 : index
    %c0_9 = arith.constant 0 : index
    %15 = vector.load %arg6[%c1, %c0_9] : memref<8x128xf32, #tpu.memory_space<vmem>>, vector<1x128xf32>
    %16 = vector.broadcast %15 : vector<1x128xf32> to vector<8x128xf32>
    %17 = arith.mulf %14, %16 : vector<8x128xf32>
    %c7_i32 = arith.constant 7 : i32
    %18 = tpu.dynamic_rotate %9 by %c7_i32 dim 1 : vector<8x128xf32>, i32 -> vector<8x128xf32>
    %c2 = arith.constant 2 : index
    %c0_10 = arith.constant 0 : index
    %19 = vector.load %arg6[%c2, %c0_10] : memref<8x128xf32, #tpu.memory_space<vmem>>, vector<1x128xf32>
    %20 = vector.broadcast %19 : vector<1x128xf32> to vector<8x128xf32>
    %21 = arith.mulf %18, %20 : vector<8x128xf32>
    %c1_i32 = arith.constant 1 : i32
    %22 = tpu.dynamic_rotate %9 by %c1_i32 dim 1 : vector<8x128xf32>, i32 -> vector<8x128xf32>
    %c3 = arith.constant 3 : index
    %c0_11 = arith.constant 0 : index
    %23 = vector.load %arg6[%c3, %c0_11] : memref<8x128xf32, #tpu.memory_space<vmem>>, vector<1x128xf32>
    %24 = vector.broadcast %23 : vector<1x128xf32> to vector<8x128xf32>
    %25 = arith.mulf %22, %24 : vector<8x128xf32>
    %c127_i32 = arith.constant 127 : i32
    %26 = tpu.dynamic_rotate %9 by %c127_i32 dim 1 : vector<8x128xf32>, i32 -> vector<8x128xf32>
    %c4 = arith.constant 4 : index
    %c0_12 = arith.constant 0 : index
    %27 = vector.load %arg6[%c4, %c0_12] : memref<8x128xf32, #tpu.memory_space<vmem>>, vector<1x128xf32>
    %28 = vector.broadcast %27 : vector<1x128xf32> to vector<8x128xf32>
    %29 = arith.mulf %26, %28 : vector<8x128xf32>
    %c121_i32 = arith.constant 121 : i32
    %30 = tpu.dynamic_rotate %9 by %c121_i32 dim 1 : vector<8x128xf32>, i32 -> vector<8x128xf32>
    %c5 = arith.constant 5 : index
    %c0_13 = arith.constant 0 : index
    %31 = vector.load %arg6[%c5, %c0_13] : memref<8x128xf32, #tpu.memory_space<vmem>>, vector<1x128xf32>
    %32 = vector.broadcast %31 : vector<1x128xf32> to vector<8x128xf32>
    %33 = arith.mulf %30, %32 : vector<8x128xf32>
    %c120_i32 = arith.constant 120 : i32
    %34 = tpu.dynamic_rotate %9 by %c120_i32 dim 1 : vector<8x128xf32>, i32 -> vector<8x128xf32>
    %c6 = arith.constant 6 : index
    %c0_14 = arith.constant 0 : index
    %35 = vector.load %arg6[%c6, %c0_14] : memref<8x128xf32, #tpu.memory_space<vmem>>, vector<1x128xf32>
    %36 = vector.broadcast %35 : vector<1x128xf32> to vector<8x128xf32>
    %37 = arith.mulf %34, %36 : vector<8x128xf32>
    %c119_i32 = arith.constant 119 : i32
    %38 = tpu.dynamic_rotate %9 by %c119_i32 dim 1 : vector<8x128xf32>, i32 -> vector<8x128xf32>
    %c7 = arith.constant 7 : index
    %c0_15 = arith.constant 0 : index
    %39 = vector.load %arg6[%c7, %c0_15] : memref<8x128xf32, #tpu.memory_space<vmem>>, vector<1x128xf32>
    %40 = vector.broadcast %39 : vector<1x128xf32> to vector<8x128xf32>
    %41 = arith.mulf %38, %40 : vector<8x128xf32>
    %42 = tpu.concatenate %13, %17, %21, %25, %9, %29, %33, %37, %41 in 0 : vector<8x128xf32>, vector<8x128xf32>, vector<8x128xf32>, vector<8x128xf32>, vector<8x128xf32>, vector<8x128xf32>, vector<8x128xf32>, vector<8x128xf32>, vector<8x128xf32> -> vector<72x128xf32>
    %c0_16 = arith.constant 0 : index
    %c0_17 = arith.constant 0 : index
    %43 = vector.load %arg4[%c0_16, %c0_17] : memref<16x72xbf16, #tpu.memory_space<vmem>>, vector<16x72xbf16>
    %44 = arith.truncf %42 : vector<72x128xf32> to vector<72x128xbf16>
    %cst_18 = arith.constant dense<0.000000e+00> : vector<16x128xf32>
    %45 = tpu.matmul %43, %44, %cst_18 {dimension_numbers = #tpu.dot_dimension_numbers<[1], [0], [0], [1], [0, 0, 1, 1], [], []>} : vector<16x72xbf16>, vector<72x128xbf16>, vector<16x128xf32> -> vector<16x128xf32>
    %c0_19 = arith.constant 0 : index
    %c0_20 = arith.constant 0 : index
    %46 = vector.load %arg5[%c0_19, %c0_20] : memref<16x1xf32, #tpu.memory_space<vmem>>, vector<16x1xf32>
    %47 = vector.broadcast %46 : vector<16x1xf32> to vector<16x128xf32>
    %48 = arith.addf %45, %47 : vector<16x128xf32>
    %49 = arith.addf %48, %1 : vector<16x128xf32>
    %cst_21 = arith.constant 0.000000e+00 : f32
    %50 = vector.broadcast %cst_21 : f32 to vector<16x128xf32>
    %51 = arith.maximumf %49, %50 : vector<16x128xf32>
    %c0_22 = arith.constant 0 : index
    %c0_23 = arith.constant 0 : index
    %c0_24 = arith.constant 0 : index
    %52 = vector.load %arg7[%c0_22, %c0_23, %c0_24] : memref<1x16x128xf32, #tpu.memory_space<vmem>>, vector<1x16x128xf32>
    %53 = vector.shape_cast %52 : vector<1x16x128xf32> to vector<16x128xf32>
    %54 = vector.shape_cast %51 : vector<16x128xf32> to vector<1x16x128xf32>
    tpu.vector_store %arg7[%c0_22, %c0_23, %c0_24], %54 {strides = array<i32>} : memref<1x16x128xf32, #tpu.memory_space<vmem>>, vector<1x16x128xf32>,
    return
  }
  func.func @transform_0(%arg0: i32) -> (i32, i32, i32) {
    %c0_i32 = arith.constant 0 : i32
    %c0_i32_0 = arith.constant 0 : i32
    %c0_i32_1 = arith.constant 0 : i32
    return %arg0, %c0_i32, %c0_i32_0 : i32, i32, i32
  }
  func.func @transform_1(%arg0: i32) -> (i32, i32) {
    %c0_i32 = arith.constant 0 : i32
    %c0_i32_0 = arith.constant 0 : i32
    %c0_i32_1 = arith.constant 0 : i32
    return %c0_i32, %c0_i32_0 : i32, i32
  }
  func.func @transform_2(%arg0: i32) -> (i32, i32) {
    %c0_i32 = arith.constant 0 : i32
    %c0_i32_0 = arith.constant 0 : i32
    %c0_i32_1 = arith.constant 0 : i32
    return %c0_i32, %c0_i32_0 : i32, i32
  }
  func.func @transform_3(%arg0: i32) -> (i32, i32) {
    %c0_i32 = arith.constant 0 : i32
    %c0_i32_0 = arith.constant 0 : i32
    %c0_i32_1 = arith.constant 0 : i32
    return %c0_i32, %c0_i32_0 : i32, i32
  }
  func.func @transform_4(%arg0: i32) -> (i32, i32) {
    %c0_i32 = arith.constant 0 : i32
    %c0_i32_0 = arith.constant 0 : i32
    %c0_i32_1 = arith.constant 0 : i32
    return %c0_i32, %c0_i32_0 : i32, i32
  }
  func.func @transform_5(%arg0: i32) -> (i32, i32) {
    %c0_i32 = arith.constant 0 : i32
    %c0_i32_0 = arith.constant 0 : i32
    %c0_i32_1 = arith.constant 0 : i32
    return %c0_i32, %c0_i32_0 : i32, i32
  }
  func.func @transform_6(%arg0: i32) -> (i32, i32, i32) {
    %c0_i32 = arith.constant 0 : i32
    %c0_i32_0 = arith.constant 0 : i32
    %c0_i32_1 = arith.constant 0 : i32
    return %arg0, %c0_i32, %c0_i32_0 : i32, i32, i32
  }
}

</mosaic_0001>

<bundles_post_ra>
// kernel: tpu_custom_call.1
= control target key start
LH: loop header
LB: loop body
LE: loop exit
PB: predicated region body
PF: predicated region fallthrough
CT: control target
= control target key end

     0   :  { %11 = vsyncpa [#allocation3], 0  ;;  %s1046_s0 = inlined_call_operand.hbm [shape: f32[2,16,128], index: 0, kind: input, shape index: {}]   ;;  %s1047_s1 = inlined_call_operand.vmem [shape: bf16[8,16], index: 1, kind: input, shape index: {}]   ;;  %s1048_s2 = inlined_call_operand.vmem [shape: f32[8,1], index: 2, kind: input, shape index: {}]   ;;  %s1049_s3 = inlined_call_operand.vmem [shape: bf16[16,72], index: 3, kind: input, shape index: {}]   ;;  %s1050_s4 = inlined_call_operand.vmem [shape: f32[16,1], index: 4, kind: input, shape index: {}]   ;;  %s1051_s5 = inlined_call_operand.vmem [shape: f32[8,128], index: 5, kind: input, shape index: {}]   ;;  %s1052_s6 = inlined_call_operand.hbm [shape: f32[2,16,128], index: 6, kind: output, shape index: {}]  }
   0x1   :  { %13 = vsyncpa [#allocation3 + $0x1], 0 }
   0x2   :  { %14 = vsyncpa [#allocation4], 0 }
   0x3   :  { %16 = vsyncpa [#allocation4 + $0x1], 0  ;;  %s823_s21 = smov 0   ;;  %s825_s22 = smov 0  }
   0x4   :  { %s827_s23 = smov 0   ;;  %s829_s24 = smov 0  }
   0x5 LB: > { %s844_s25 = sadd.s32 4294967295, %s770_s24   ;;  %s556_s26 = sadd.s32 4294967294, %s770_s24   ;;  %s770_s24 = sphi %s829_s24, %s1065_s24   ;;  %s766_s23 = sphi %s827_s23, %s1064_s23   ;;  %s762_s22 = sphi %s825_s22, %s1063_s22   ;;  %s758_s21 = sphi %s823_s21, %s1062_s21  }
   0x6   : > { %s848_s27 = sadd.s32 1, %s770_s24   ;;  %s29_s28 = sadd.s32 1, %s766_s23 }
   0x7   : > { %s26_s29 = ssub.s32 %s770_s24, %s848_s27  ;;  %p36_p0 = scmp.ne.s32.totalorder %s766_s23, %s762_s22 }
   0x8   : > { %p27_p1 = scmp.eq.s32.totalorder %s26_s29, 0  ;;  %p37_p2 = scmp.eq.s32.totalorder %s770_s24, 0 }
   0x9   : > { %p42_p3 = scmp.ne.s32.totalorder %s762_s22, %s758_s21  ;;  %p43_p4 = scmp.eq.s32.totalorder %s844_s25, 0 }
   0xa   : > { %s860_s30 = scalar_select %p27_p1, %s766_s23, %s29_s28  }
   0xb   : > { %p862_p5 = por %p37_p2, %p36_p0  ;;  %p866_p6 = por %p43_p4, %p42_p3 }
   0xc   : > { %p171_p7 = scmp.eq.s32.totalorder %s844_s25, 1  ;;  %p177_p8 = scmp.eq.s32.totalorder %s556_s26, 1 }
   0xd   : > { %p623_p10 = scmp.lt.s32.totalorder %s770_s24, 2  ;;  %s212_s11 = sand.u32 1, %s766_s23  }
   0xe   : > { %p873_p11 = por %p171_p7, %p36_p0  ;;  %p877_p12 = por %p177_p8, %p42_p3 }
   0xf   : > { %s581_s12 = sshll.u32 %s770_s24, 8  ;;  %s559_s13 = sshll.u32 %s212_s11, 4 }
  0x10   : > { %s1056_s9 = scalar_select %p873_p11, 1, 0 }
  0x11   : > { %s1057_s10 = scalar_select %p877_p12, 1, 0 }
  0x12   : > { %s886_s16 = scalar_lea.hbm %s1046_s0, %s581_s12  ;;  %s216_s17 = scalar_lea.vmem [#allocation2], %s559_s13 }
  0x13   : > { %s223_s18 = sshll.u32 %s216_s17, 4  ;;  %p890_p13 = pnand %p623_p10, %p862_p5  ;;  %s894_s18 = int_to_ptr.vmem [resolvable:$true] %s223_s18 }
  0x14   : > { %s896_s20 = scalar_lea.sflag [#allocation3], %s212_s11  ;;  %s674_s26 = scalar_lea.hbm %s886_s16, 256 }
  0x15   : > { %p675_p0 = scmp.ne.s32.totalorder %s886_s16, %s674_s26  ;;  %p676_p1 = pneg %p890_p13 }
  0x16   : > { %s679_s7 = scalar_lea.hbm %s1046_s0, 512  ;;  %p680_p4 = scmp.lt.u32.totalorder %s886_s16, %s1046_s0 }
  0x17   : > { %p677_p2 = pnand %p676_p1, %p675_p0  ;;  %p681_p5 = scmp.lt.u32.totalorder %s679_s7, %s674_s26 }
  0x18   : > { %p683_p8 = scmp.lt.u32.totalorder %s674_s26, %s886_s16 }
  0x19   : > { %p678_p3 = pneg %p677_p2  ;;  %p682_p7 = por %p681_p5, %p680_p4 }
  0x1b   : > { %p684_p10 = por %p683_p8, %p682_p7 }
  0x1d   : > { %p685_p9 = pnand %p684_p10, %p678_p3 }
  0x1f   : > { %688 = shalt.err (!%p685_p9)
}
  0x20   : > { %s689_s11 = scalar_lea.vmem %s894_s18, 256  ;;  %s772_s14 = smov [#allocation2]  }
  0x21   : > { %p690_p0 = scmp.ne.s32.totalorder %s894_s18, %s689_s11  ;;  %s694_s15 = sshll.u32 %s772_s14, 4  ;;  %s695_s15 = int_to_ptr.vmem [resolvable:$false] %s694_s15 }
  0x22   : > { %s696_s17 = scalar_lea.vmem %s695_s15, 512  ;;  %p697_p11 = scmp.lt.s32.totalorder %s894_s18, %s695_s15 }
  0x23   : > { %p692_p2 = pnand %p690_p0, %p676_p1  ;;  %p698_p4 = scmp.lt.s32.totalorder %s696_s17, %s689_s11 }
  0x25   : > { %p693_p12 = pneg %p692_p2  ;;  %p699_p5 = por %p698_p4, %p697_p11 }
  0x27   : > { %p700_p7 = pnand %p699_p5, %p693_p12 }
  0x29   : > { %703 = shalt.err (!%p700_p7)
}
  0x2a   : > { %s773_s26 = smov 128   ;;  %s774_s28 = smov 8  }
  0x2b   : > { %618 = dma.hbm_to_vmem [thread:$0]  (!%p890_p13), %s886_s16, 256, %s894_s18, %s896_s20, %s773_s26, %s773_s26, %s774_s28  }
  0x2c   : > { %p562_p9 = scmp.ge.s32.totalorder %s770_s24, 1  ;;  %p231_p1 = scmp.lt.s32.totalorder %s770_s24, 3 }
  0x2e   : > { %p232_p3 = pnand %p562_p9, %p231_p1 }
  0x2f   : > { %s927_s29 = sand.u32 (!%p232_p3), 1, %s762_s22  }
  0x30   : > { %235 = sbr.rel (%p232_p3) target bundleno = 652 (0x28c), region = 44  ;;  %s563_s7 = sshll.u32 (!%p232_p3), %s927_s29, 4 }
  0x31   : > { %s238_s12 = scalar_lea.sflag (!%p232_p3), [#allocation3], %s927_s29  ;;  %s241_s13 = scalar_lea.vmem (!%p232_p3), [#allocation2], %s563_s7 }
  0x37   : > { %749 = dma.done.wait (%p866_p6), %s238_s12, 256  }
  0x38   : > { %751 = vsyncadd (%p866_p6), %s238_s12, 4294967040  ;;  %v775_v0 = vmov 0.0   ;;  %vm776_vm0 = vmmov 0   ;;  %v777_v1 = vmov 0   ;;  %v941_v2 = vld [vmem:[%s241_s13] sm:$0xff]  ;;  %v943_v3 = vld [vmem:[%s241_s13 + $0x8] sm:$0xff] }
  0x39   : > { %591 = vmatprep.subr.bf16.mxu0 %v775_v0  ;;  %593 = vmatprep.mubr.msk.bf16.mxu0 %vm776_vm0, %v775_v0  ;;  %v274_v4 = vpack.c.bf16 %v943_v3, %v941_v2  ;;  %v275_v5 = vld [vmem:[%s1048_s2] sm:$0xff]  ;;  %vm281_vm1 = vcmask 130048   ;;  %s778_s20 = smov 8   ;;  %s779_s11 = smov 9   ;;  %v398_v14 = vld [vmem:[%s1050_s4 + $0x8] sm:$0xff]  ;;  %vm418_vm2 = vcmask 1043456  }
  0x3a   : > { %671 = vset.pattern.permute.xlu0 %v777_v1  ;;  %597 = vmatprep.subr.bf16.mxu1 %v775_v0  ;;  %v273_v6 = vld [vmem:[%s1047_s1] sm:$0xf]  ;;  %s780_s14 = smov 7   ;;  %s781_s15 = smov 1   ;;  %v570_v29 = vld [vmem:[%s1051_s5 + $0x4] ss:$0 sm:$0xff] }
  0x3b   : > { %607 = vmatprep.mubr.msk.bf16.mxu1 %vm776_vm0, %v775_v0  ;;  %672 = vset.pattern.permute.xlu1 %v777_v1  ;;  %s782_s17 = smov 127   ;;  %s783_s26 = smov 121   ;;  %v397_v15 = vld [vmem:[%s1050_s4] sm:$0xff]  ;;  %vm414_vm3 = vcmask 588800  }
  0x3c   : > { %278 = vperm.xlu0 %671, %v275_v5   ;;  %592 = vmatpush3.bf16.msra.mxu0 %v274_v4  ;;  %s784_s28 = smov 120   ;;  %s785_s12 = smov 119   ;;  %v567_v16 = vld [vmem:[%s1051_s5 + $0x1] ss:$0 sm:$0xff]  ;;  %v566_v17 = vld [vmem:[%s1051_s5] ss:$0 sm:$0xff] }
  0x3d   : > { %v568_v22 = vld [vmem:[%s1051_s5 + $0x2] ss:$0 sm:$0xff]  ;;  %v569_v23 = vld [vmem:[%s1051_s5 + $0x3] ss:$0 sm:$0xff]  ;;  %v571_v34 = vld [vmem:[%s1051_s5 + $0x5] ss:$0 sm:$0xff] }
  0x3e   : > { %v572_v35 = vld [vmem:[%s1051_s5 + $0x6] ss:$0 sm:$0xff]  ;;  %v573_v36 = vld [vmem:[%s1051_s5 + $0x7] ss:$0 sm:$0xff]  ;;  %s582_s13 = sshll.u32 %s844_s25, 8  ;;  %p1059_p11 = scmp.ne.s32.totalorder %s1056_s9, 0 }
  0x3f   : > { %594 = vmatmul.mubr.msk.bf16.vlgmr.msra.gmra.mrb[0].mxu0 %vm281_vm1, %v273_v6  ;;  %v673_v46 = vld [vmem:[%s1049_s3] sm:$0xff]   ;;  %s1001_s18 = scalar_lea.hbm %s1052_s6, %s582_s13  ;;  %s786_s25 = smov [#allocation5]  }
  0xbb   : > { %v279_v7 = vpop.permute.xlu0 %278 }
 0x112   : > { %v319_v8 = vpop.f32.mrb[0].mxu0 }
 0x113   : > { %v320_v9 = vadd.f32 %v319_v8, %v279_v7  ;;  %v595_v10 = vpop.f32.mrb[1].mxu0 }
 0x114   : > { %v322_v11 = vpop.f32.mrb[2].mxu0 }
 0x115   : > { %v325_v12 = vmax.f32 %v320_v9, 0.0  ;;  %v596_v13 = vpop.f32.mrb[3].mxu0 }
 0x117   : > { %334 = vrot.lane.b32.xlu1 %v325_v12, %s778_s20  ;;  %326 = vrot.lane.b32.xlu0 %v325_v12, %s779_s11  ;;  %s708_s11 = sshll.u32 %s786_s25, 4  ;;  %s709_s11 = int_to_ptr.vmem [resolvable:$false] %s708_s11 }
 0x11b   : > { %342 = vrot.lane.b32.xlu1 %v325_v12, %s780_s14  ;;  %350 = vrot.lane.b32.xlu0 %v325_v12, %s781_s15  ;;  %s710_s14 = scalar_lea.vmem %s709_s11, 512 }
 0x11f   : > { %358 = vrot.lane.b32.xlu1 %v325_v12, %s782_s17  ;;  %366 = vrot.lane.b32.xlu0 %v325_v12, %s783_s26 }
 0x123   : > { %374 = vrot.lane.b32.xlu1 %v325_v12, %s784_s28  ;;  %382 = vrot.lane.b32.xlu0 %v325_v12, %s785_s12  ;;  %s269_s28 = scalar_lea.vmem [#allocation5], %s563_s7  ;;  %s470_s7 = scalar_lea.sflag [#allocation4], %s927_s29 }
 0x124   : > { %s483_s12 = sshll.u32 %s269_s28, 4  ;;  %s996_s12 = int_to_ptr.vmem [resolvable:$true] %s483_s12 }
 0x125   : > { %s704_s19 = scalar_lea.vmem %s996_s12, 256  ;;  %p711_p8 = scmp.lt.s32.totalorder %s996_s12, %s709_s11 }
 0x126   : > { %p705_p6 = scmp.ne.s32.totalorder %s996_s12, %s704_s19  ;;  %p712_p10 = scmp.lt.s32.totalorder %s710_s14, %s704_s19 }
 0x127   : > { %406 = vperm.xlu0 %671, %v398_v14   ;;  %401 = vperm.xlu1 %672, %v397_v15  }
 0x128   : > { %p706_p12 = pnand %p705_p6, %p1059_p11  ;;  %p713_p0 = por %p712_p10, %p711_p8 }
 0x12a   : > { %p707_p13 = pneg %p706_p12 }
 0x12c   : > { %p714_p2 = pnand %p713_p0, %p707_p13 }
 0x189   : > { %v335_v18 = vpop.permute.xlu1 %334  ;;  %v327_v19 = vpop.permute.xlu0 %326 }
 0x18a   : > { %v341_v20 = vmul.f32 %v567_v16, %v335_v18  ;;  %v333_v21 = vmul.f32 %v566_v17, %v327_v19 }
 0x18c   : > { %v392_v24 = vpack.c.bf16 %v341_v20, %v333_v21 }
 0x18d   : > { %v343_v25 = vpop.permute.xlu1 %342  ;;  %v351_v26 = vpop.permute.xlu0 %350 }
 0x18e   : > { %v349_v27 = vmul.f32 %v568_v22, %v343_v25  ;;  %v357_v28 = vmul.f32 %v569_v23, %v351_v26  ;;  %598 = vmatpush3.bf16.msra.mxu1 %v392_v24 }
 0x18f   : > { %599 = vmatprep.subr.bf16.mxu1 %v775_v0 }
 0x190   : > { %v393_v30 = vpack.c.bf16 %v357_v28, %v349_v27 }
 0x191   : > { %v359_v31 = vpop.permute.xlu1 %358  ;;  %v367_v32 = vpop.permute.xlu0 %366 }
 0x192   : > { %v365_v33 = vmul.f32 %v570_v29, %v359_v31  ;;  %600 = vmatpush3.bf16.msra.mxu1 %v393_v30  ;;  %v373_v40 = vmul.f32 %v571_v34, %v367_v32 }
 0x193   : > { %601 = vmatprep.subr.bf16.mxu1 %v775_v0 }
 0x194   : > { %v394_v37 = vpack.c.bf16 %v365_v33, %v325_v12 }
 0x195   : > { %v375_v38 = vpop.permute.xlu1 %374  ;;  %v383_v39 = vpop.permute.xlu0 %382 }
 0x196   : > { %v381_v41 = vmul.f32 %v572_v35, %v375_v38  ;;  %v389_v42 = vmul.f32 %v573_v36, %v383_v39  ;;  %602 = vmatpush3.bf16.msra.mxu1 %v394_v37 }
 0x197   : > { %603 = vmatprep.subr.bf16.mxu1 %v775_v0 }
 0x198   : > { %v395_v43 = vpack.c.bf16 %v381_v41, %v373_v40  ;;  %v396_v44 = vpack.c.bf16 %v389_v42, %v389_v42 }
 0x19a   : > { %604 = vmatpush3.bf16.msra.mxu1 %v395_v43  ;;  %v420_v45 = vsel %vm418_vm2, %v396_v44, 0 }
 0x19b   : > { %605 = vmatprep.subr.bf16.mxu1 %v775_v0 }
 0x19e   : > { %606 = vmatpush3.bf16.msra.mxu1 %v420_v45 }
 0x1a1   : > { %608 = vmatmul.mubr.msk.bf16.vlgmr.msra.gmra.mrb[0].mxu1 %vm414_vm3, %v673_v46 }
 0x1a6   : > { %v402_v47 = vpop.permute.xlu1 %401  ;;  %v407_v51 = vpop.permute.xlu0 %406 }
 0x274   : > { %v456_v48 = vpop.f32.mrb[0].mxu1 }
 0x275   : > { %v457_v49 = vadd.f32 %v456_v48, %v402_v47  ;;  %v609_v50 = vpop.f32.mrb[1].mxu1 }
 0x276   : > { %v459_v52 = vpop.f32.mrb[2].mxu1 }
 0x277   : > { %v463_v53 = vadd.f32 %v457_v49, %v941_v2  ;;  %v460_v54 = vadd.f32 %v459_v52, %v407_v51  ;;  %v610_v55 = vpop.f32.mrb[3].mxu1 }
 0x279   : > { %v465_v56 = vmax.f32 %v463_v53, 0.0  ;;  %v464_v57 = vadd.f32 %v460_v54, %v943_v3 }
 0x27b   : > { %467 = vst [vmem:[%s269_s28] sm:$0xff] %v465_v56  ;;  %v466_v58 = vmax.f32 %v464_v57, 0.0 }
 0x27d   : > { %468 = vst [vmem:[%s269_s28 + $0x8] sm:$0xff] %v466_v58 }
 0x27e   : > { %717 = shalt.err (!%p714_p2)
}
 0x27f   : > { %s718_s15 = scalar_lea.hbm %s1001_s18, 256  ;;  %s722_s28 = scalar_lea.hbm %s1052_s6, 512 }
 0x280   : > { %p719_p4 = scmp.ne.s32.totalorder %s1001_s18, %s718_s15  ;;  %p723_p9 = scmp.lt.u32.totalorder %s1001_s18, %s1052_s6 }
 0x281   : > { %p724_p1 = scmp.lt.u32.totalorder %s722_s28, %s718_s15  ;;  %p726_p6 = scmp.lt.u32.totalorder %s718_s15, %s1001_s18 }
 0x282   : > { %p720_p5 = pnand %p719_p4, %p1059_p11 }
 0x283   : > { %p725_p3 = por %p724_p1, %p723_p9 }
 0x284   : > { %p721_p7 = pneg %p720_p5 }
 0x285   : > { %p727_p12 = por %p726_p6, %p725_p3 }
 0x287   : > { %p728_p13 = pnand %p727_p12, %p721_p7 }
 0x289   : > { %731 = shalt.err (!%p728_p13)
}
 0x28a   : > { %s787_s16 = smov 128  }
 0x28b   : > { %613 = dma.vmem_to_hbm [thread:$0]  (%p1059_p11), %s996_s12, 256, %s1001_s18, %s470_s7, %s787_s16, %s787_s16, %s778_s20  }
 0x28c PF: > { %s498_s19 = sand.u32 1, %s758_s21   ;;  %p1060_p8 = scmp.ne.s32.totalorder %s1057_s10, 0 }
 0x28d   : > { %p1061_p10 = scmp.ge.s32.totalorder %s770_s24, 2  ;;  %s499_s25 = scalar_lea.sflag [#allocation4], %s498_s19 }
 0x28f   : > { %p620_p0 = pnand %p1061_p10, %p1060_p8 }
 0x291   : > { %753 = dma.done.wait (!%p620_p0), %s499_s25, 256  }
 0x292   : > { %755 = vsyncadd (!%p620_p0), %s499_s25, 4294967040  ;;  %p19_p2 = scmp.ge.s32.totalorder %s848_s27, 4   ;;  %s1062_s21 = smov %s762_s22 }
 0x293   : > { %s1063_s22 = smov %s766_s23  ;;  %s1064_s23 = smov %s860_s30 }
 0x294   : > { %s1065_s24 = smov %s848_s27  ;;  %21 = sbr.rel (!%p19_p2) target bundleno = 5 (0x5), region = 89 }
 0x29b   :  { %504 = vsyncpa [#allocation3], 1 }
 0x29c   :  { %506 = vsyncpa [#allocation3 + $0x1], 1 }
 0x29d   :  { %507 = vsyncpa [#allocation4], 1 }
 0x29e   :  { %509 = vsyncpa [#allocation4 + $0x1], 1 }

</bundles_post_ra>
